<compile_context>
chip_gen: v6e
topology: v6e:2x2x1
jax: 0.10.0
libtpu: 0.0.40
codegen_flags: <defaults>
</compile_context>

<pallas_src>
import functools

import jax
import jax.numpy as jnp
from jax import lax
from jax.experimental import pallas as pl
from jax.experimental.pallas import tpu as pltpu


# ----------------------------------------------------------------------------
# Fused forward kernel:
#   h1 = GAT(relu(x));  h2 = GAT(relu(h1));  out = [gmp(h2) | gap(h2)] @ Wfc + b
# ----------------------------------------------------------------------------
def gat_regressor_kernel(x_ref, bias_ref, p1_ref, p2_ref, fc_ref, o_ref,
                         *, f_in, hidden, hp, n_graphs, n_per_graph):
    f32 = jnp.float32
    bf16 = jnp.bfloat16
    neg_slope = f32(0.2)

    adj_bias = bias_ref[...]                       # [N, N] f32: 0 on edge, -1e30 off

    def gat_conv(x_in, p_ref, in_dim):
        # Fused ReLU on the layer input (matches relu->conv1, relu->conv2).
        x = jnp.maximum(x_in, 0.0)
        # Packed params: rows [0,in_dim) = W (padded col `hidden` holds
        # W @ att_dst), row in_dim = bias, row in_dim+1 = att_src.
        w = p_ref[0:in_dim, :]                     # [in_dim, Hp]
        b = p_ref[in_dim:in_dim + 1, :]            # [1, Hp]
        att_src = p_ref[in_dim + 1:in_dim + 2, :]  # [1, Hp]
        # Projection on the MXU (bf16 operands, f32 accumulation).
        h = jnp.dot(x.astype(bf16), w.astype(bf16),
                    preferred_element_type=f32)    # [N, Hp]
        hb = h.astype(bf16)
        # a_dst[i] = <h_i, att_dst> comes for free from the folded column.
        a_dst = h[:, hidden:hidden + 1]            # [N, 1] f32
        # a_src[j] = <h_j, att_src> as an MXU dot_general producing a row
        # (no XLU transpose, no cross-lane VPU reduction).
        a_src = lax.dot_general(att_src.astype(bf16), hb,
                                (((1,), (1,)), ((), ())),
                                preferred_element_type=f32)          # [1, N]
        e = a_dst + a_src                          # e[i,j] = a_dst[i] + a_src[j]
        e = jnp.maximum(e, neg_slope * e)          # LeakyReLU(0.2)
        e = e + adj_bias                           # additive mask on non-edges
        m = jnp.max(e, axis=-1, keepdims=True)     # finite: self-loops on diag
        p = jnp.exp(e - m)                         # exactly 0 on non-edges
        inv_den = pl.reciprocal(jnp.sum(p, axis=-1, keepdims=True), approx=True)
        alpha = p * inv_den                        # per-destination softmax
        # Neighborhood aggregation on the MXU; bias added after (PyG order).
        return jnp.dot(alpha.astype(bf16), hb, preferred_element_type=f32) + b

    h1 = gat_conv(x_ref[...], p1_ref, f_in)        # conv1(relu(x))
    h2 = gat_conv(h1, p2_ref, hp)                  # conv2(relu(h1)); pooled un-ReLU'd

    # ---- global max / mean pool (contiguous, equal-size graphs) -------------
    # Layout-free reshape: n_per_graph is a multiple of 8 (asserted in wrapper).
    h2r = h2.reshape(n_graphs, n_per_graph, hp)
    max_p = jnp.max(h2r, axis=1)                                   # [B, Hp]
    mean_p = jnp.sum(h2r, axis=1) * f32(1.0 / n_per_graph)         # [B, Hp]

    # ---- fc1 on cat([gmp, gap]) (concat folded into two matmuls) ------------
    w_max = fc_ref[0:hp, :]
    w_mean = fc_ref[hp:2 * hp, :]
    b_fc = fc_ref[2 * hp:2 * hp + 1, :]
    out = (jnp.dot(max_p.astype(bf16), w_max.astype(bf16),
                   preferred_element_type=f32)
           + jnp.dot(mean_p.astype(bf16), w_mean.astype(bf16),
                     preferred_element_type=f32)
           + b_fc)                                                  # [B, out_dim]
    o_ref[...] = out


# ----------------------------------------------------------------------------
# Parameter packing + wrapper: single grid-less pallas_call, 5 inputs.
# ----------------------------------------------------------------------------
def _pad_cols(a, width):
    return jnp.pad(a, ((0, 0), (0, width - a.shape[1])))


def _pack_gat_layer(w, b, att_src, att_dst, in_dim, hidden, hp):
    """[in_dim+2, hp] slab: row-padded W (att_dst folded into padded column
    `hidden`), then bias, then att_src."""
    w_rows = jnp.pad(w, ((0, in_dim - w.shape[0]), (0, 0)))         # [in_dim, hidden]
    wp = _pad_cols(w_rows, hp)                                      # [in_dim, hp]
    fold = w_rows @ att_dst.reshape(hidden, 1)                      # f32 [in_dim, 1]
    wp = wp.at[:, hidden:hidden + 1].set(fold)
    return jnp.concatenate([wp, _pad_cols(b, hp), _pad_cols(att_src, hp)], axis=0)


def gat_regressor_forward(params, x, adj_bias, n_graphs):
    f_in, hidden = params["w1"].shape
    out_dim = params["w_fc_max"].shape[1]
    n_nodes = x.shape[0]

    # Lane-dense padded widths; hp keeps at least one spare column for the
    # att_dst fold.  TODO(synk): pad hp to a multiple of 256 on v6e/v7x once
    # hidden exceeds 128 (2x256^2 MXU there; v5e is matched at 128).
    hp = ((hidden + 1 + 127) // 128) * 128
    fp = ((f_in + 127) // 128) * 128

    assert n_nodes % n_graphs == 0, "graphs must be contiguous and equal-size"
    n_per_graph = n_nodes // n_graphs
    assert n_per_graph % 8 == 0, "reshape pooling needs N/B to be a sublane multiple"

    # Zero-padding is exact: padded x columns hit zero W rows, padded W/bias
    # columns produce zero feature columns that hit zero fc rows.
    x_p = _pad_cols(x, fp)                                          # [N, fp]
    p1 = _pack_gat_layer(params["w1"], params["b1"], params["att_src1"],
                         params["att_dst1"], fp, hidden, hp)        # [fp+2, hp]
    p2 = _pack_gat_layer(params["w2"], params["b2"], params["att_src2"],
                         params["att_dst2"], hp, hidden, hp)        # [hp+2, hp]
    fc = jnp.concatenate([
        jnp.pad(params["w_fc_max"], ((0, hp - hidden), (0, 0))),
        jnp.pad(params["w_fc_mean"], ((0, hp - hidden), (0, 0))),
        params["b_fc"],
    ], axis=0)                                                      # [2*hp+1, out]

    kernel = functools.partial(
        gat_regressor_kernel, f_in=fp, hidden=hidden, hp=hp,
        n_graphs=n_graphs, n_per_graph=n_per_graph)

    vmem_spec = pl.BlockSpec(memory_space=pltpu.MemorySpace.VMEM)
    return pl.pallas_call(
        kernel,
        out_shape=jax.ShapeDtypeStruct((n_graphs, out_dim), jnp.float32),
        in_specs=[vmem_spec] * 5,
        out_specs=vmem_spec,
    )(x_p, adj_bias, p1, p2, fc)


def make_params(key, num_node_features, hidden_dim, output_dim):
    ks = jax.random.split(key, 12)
    f32 = jnp.float32
    return {
        "w1":        0.1 * jax.random.normal(ks[0], (num_node_features, hidden_dim), f32),
        "att_src1":  0.1 * jax.random.normal(ks[1], (1, hidden_dim), f32),
        "att_dst1":  0.1 * jax.random.normal(ks[2], (1, hidden_dim), f32),
        "b1":        0.1 * jax.random.normal(ks[3], (1, hidden_dim), f32),
        "w2":        0.1 * jax.random.normal(ks[4], (hidden_dim, hidden_dim), f32),
        "att_src2":  0.1 * jax.random.normal(ks[5], (1, hidden_dim), f32),
        "att_dst2":  0.1 * jax.random.normal(ks[6], (1, hidden_dim), f32),
        "b2":        0.1 * jax.random.normal(ks[7], (1, hidden_dim), f32),
        # fc1 weight split into [gmp | gap] halves (concat folded into 2 matmuls)
        "w_fc_max":  0.1 * jax.random.normal(ks[8], (hidden_dim, output_dim), f32),
        "w_fc_mean": 0.1 * jax.random.normal(ks[9], (hidden_dim, output_dim), f32),
        "b_fc":      0.1 * jax.random.normal(ks[10], (1, output_dim), f32),
    }


if __name__ == "__main__":
    # Small, deterministic problem: 16 nodes, 4 node features, hidden 32,
    # 2 graphs in the batch, 2*N directed edges (no duplicates, no self loops).
    NUM_NODE_FEATURES = 4
    NUM_EDGE_FEATURES = 2   # deltaPhi, deltaEta (ignored by GATConv: edge_dim=None)
    HIDDEN_DIM = 32
    OUTPUT_DIM = 3
    N = 16
    B = 2

    key = jax.random.PRNGKey(0)
    k_x, k_p = jax.random.split(key)

    # data.x
    x = jax.random.normal(k_x, (N, NUM_NODE_FEATURES), jnp.float32)

    # data.edge_index : ring + skip-3 edges (deterministic, duplicate-free)
    src = jnp.concatenate([jnp.arange(N), jnp.arange(N)])
    dst = jnp.concatenate([(jnp.arange(N) + 1) % N, (jnp.arange(N) + 3) % N])
    edge_index = jnp.stack([src, dst], axis=0).astype(jnp.int32)          # [2, E]
    E = edge_index.shape[1]

    # data.deltaPhi / data.deltaEta — built for interface parity, unused by GATConv
    deltaPhi = jnp.sin(jnp.arange(E, dtype=jnp.float32))
    deltaEta = jnp.cos(jnp.arange(E, dtype=jnp.float32))
    edge_attr = jnp.stack([deltaPhi, deltaEta], axis=1)  # noqa: F841 (ignored, edge_dim=None)

    # data.batch : contiguous, equal-size graphs (required by the reshape pools)
    batch = (jnp.arange(N) // (N // B)).astype(jnp.int32)  # noqa: F841 (parity)

    # Dense adjacency adj[dst, src] = 1, plus self-loops (GATConv default),
    # then converted to the additive softmax mask the kernel consumes.
    adj = jnp.zeros((N, N), jnp.float32).at[edge_index[1], edge_index[0]].set(1.0)
    adj = jnp.maximum(adj, jnp.eye(N, dtype=jnp.float32))
    adj_bias = jnp.where(adj > 0, 0.0, -1e30).astype(jnp.float32)         # [N, N]

    params = make_params(k_p, NUM_NODE_FEATURES, HIDDEN_DIM, OUTPUT_DIM)

    fwd = jax.jit(gat_regressor_forward, static_argnames=("n_graphs",))
    out = fwd(params, x, adj_bias, n_graphs=B)
    out = jax.block_until_ready(out)
    assert out.shape == (B, OUTPUT_DIM)
    assert bool(jnp.all(jnp.isfinite(out)))
    print("KERNEL_OK")
</pallas_src>

<mosaic_0001>
module attributes {stable_mosaic.version = 11 : i64} {
  func.func @gat_regressor_kernel(%arg0: memref<16x128xf32, #tpu.memory_space<vmem>>, %arg1: memref<16x16xf32, #tpu.memory_space<vmem>>, %arg2: memref<130x128xf32, #tpu.memory_space<vmem>>, %arg3: memref<130x128xf32, #tpu.memory_space<vmem>>, %arg4: memref<257x3xf32, #tpu.memory_space<vmem>>, %arg5: memref<2x3xf32, #tpu.memory_space<vmem>>) attributes {dimension_semantics = [], scalar_prefetch = 0 : i64, scratch_operands = 0 : i64, tpu.core_type = #tpu.core_type<tc>} {
    %c0 = arith.constant 0 : index
    %c0_0 = arith.constant 0 : index
    %0 = vector.load %arg1[%c0, %c0_0] : memref<16x16xf32, #tpu.memory_space<vmem>>, vector<16x16xf32>
    %c0_1 = arith.constant 0 : index
    %c0_2 = arith.constant 0 : index
    %1 = vector.load %arg0[%c0_1, %c0_2] : memref<16x128xf32, #tpu.memory_space<vmem>>, vector<16x128xf32>
    %cst = arith.constant 0.000000e+00 : f32
    %2 = vector.broadcast %cst : f32 to vector<16x128xf32>
    %3 = arith.maximumf %1, %2 : vector<16x128xf32>
    %c0_3 = arith.constant 0 : index
    %c0_4 = arith.constant 0 : index
    %4 = vector.load %arg2[%c0_3, %c0_4] : memref<130x128xf32, #tpu.memory_space<vmem>>, vector<128x128xf32>
    %c128 = arith.constant 128 : index
    %c0_5 = arith.constant 0 : index
    %5 = vector.load %arg2[%c128, %c0_5] : memref<130x128xf32, #tpu.memory_space<vmem>>, vector<1x128xf32>
    %c129 = arith.constant 129 : index
    %c0_6 = arith.constant 0 : index
    %6 = vector.load %arg2[%c129, %c0_6] : memref<130x128xf32, #tpu.memory_space<vmem>>, vector<1x128xf32>
    %7 = arith.truncf %3 : vector<16x128xf32> to vector<16x128xbf16>
    %8 = arith.truncf %4 : vector<128x128xf32> to vector<128x128xbf16>
    %cst_7 = arith.constant dense<0.000000e+00> : vector<16x128xf32>
    %9 = tpu.matmul %7, %8, %cst_7 {dimension_numbers = #tpu.dot_dimension_numbers<[1], [0], [0], [1], [0, 0, 1, 1], [], []>} : vector<16x128xbf16>, vector<128x128xbf16>, vector<16x128xf32> -> vector<16x128xf32>
    %10 = arith.truncf %9 : vector<16x128xf32> to vector<16x128xbf16>
    %11 = vector.extract_strided_slice %9 {offsets = [0, 32], sizes = [16, 1], strides = [1, 1]} : vector<16x128xf32> to vector<16x1xf32>
    %12 = arith.truncf %6 : vector<1x128xf32> to vector<1x128xbf16>
    %cst_8 = arith.constant dense<0.000000e+00> : vector<1x16xf32>
    %13 = tpu.matmul %12, %10, %cst_8 {dimension_numbers = #tpu.dot_dimension_numbers<[1], [1], [0], [0], [0, 0, 1, 0], [], []>} : vector<1x128xbf16>, vector<16x128xbf16>, vector<1x16xf32> -> vector<1x16xf32>
    %14 = vector.broadcast %11 : vector<16x1xf32> to vector<16x16xf32>
    %15 = vector.broadcast %13 : vector<1x16xf32> to vector<16x16xf32>
    %16 = arith.addf %14, %15 : vector<16x16xf32>
    %cst_9 = arith.constant 2.000000e-01 : f32
    %17 = vector.broadcast %cst_9 : f32 to vector<16x16xf32>
    %18 = arith.mulf %17, %16 : vector<16x16xf32>
    %19 = arith.maximumf %16, %18 : vector<16x16xf32>
    %20 = arith.addf %19, %0 : vector<16x16xf32>
    %cst_10 = arith.constant dense<0xFF800000> : vector<16xf32>
    %21 = vector.multi_reduction <maximumf>, %20, %cst_10 [1] : vector<16x16xf32> to vector<16xf32>
    %22 = vector.shape_cast %21 : vector<16xf32> to vector<16x1xf32>
    %23 = vector.broadcast %22 : vector<16x1xf32> to vector<16x16xf32>
    %24 = arith.subf %20, %23 : vector<16x16xf32>
    %25 = math.exp %24 : vector<16x16xf32>
    %cst_11 = arith.constant dense<0.000000e+00> : vector<16xf32>
    %26 = vector.multi_reduction <add>, %25, %cst_11 [1] : vector<16x16xf32> to vector<16xf32>
    %27 = vector.shape_cast %26 : vector<16xf32> to vector<16x1xf32>
    %28 = tpu.reciprocal %27 {approx = true} : vector<16x1xf32> -> vector<16x1xf32>
    %29 = vector.broadcast %28 : vector<16x1xf32> to vector<16x16xf32>
    %30 = arith.mulf %25, %29 : vector<16x16xf32>
    %31 = arith.truncf %30 : vector<16x16xf32> to vector<16x16xbf16>
    %cst_12 = arith.constant dense<0.000000e+00> : vector<16x128xf32>
    %32 = tpu.matmul %31, %10, %cst_12 {dimension_numbers = #tpu.dot_dimension_numbers<[1], [0], [0], [1], [0, 0, 1, 1], [], []>} : vector<16x16xbf16>, vector<16x128xbf16>, vector<16x128xf32> -> vector<16x128xf32>
    %33 = vector.broadcast %5 : vector<1x128xf32> to vector<16x128xf32>
    %34 = arith.addf %32, %33 : vector<16x128xf32>
    %cst_13 = arith.constant 0.000000e+00 : f32
    %35 = vector.broadcast %cst_13 : f32 to vector<16x128xf32>
    %36 = arith.maximumf %34, %35 : vector<16x128xf32>
    %c0_14 = arith.constant 0 : index
    %c0_15 = arith.constant 0 : index
    %37 = vector.load %arg3[%c0_14, %c0_15] : memref<130x128xf32, #tpu.memory_space<vmem>>, vector<128x128xf32>
    %c128_16 = arith.constant 128 : index
    %c0_17 = arith.constant 0 : index
    %38 = vector.load %arg3[%c128_16, %c0_17] : memref<130x128xf32, #tpu.memory_space<vmem>>, vector<1x128xf32>
    %c129_18 = arith.constant 129 : index
    %c0_19 = arith.constant 0 : index
    %39 = vector.load %arg3[%c129_18, %c0_19] : memref<130x128xf32, #tpu.memory_space<vmem>>, vector<1x128xf32>
    %40 = arith.truncf %36 : vector<16x128xf32> to vector<16x128xbf16>
    %41 = arith.truncf %37 : vector<128x128xf32> to vector<128x128xbf16>
    %cst_20 = arith.constant dense<0.000000e+00> : vector<16x128xf32>
    %42 = tpu.matmul %40, %41, %cst_20 {dimension_numbers = #tpu.dot_dimension_numbers<[1], [0], [0], [1], [0, 0, 1, 1], [], []>} : vector<16x128xbf16>, vector<128x128xbf16>, vector<16x128xf32> -> vector<16x128xf32>
    %43 = arith.truncf %42 : vector<16x128xf32> to vector<16x128xbf16>
    %44 = vector.extract_strided_slice %42 {offsets = [0, 32], sizes = [16, 1], strides = [1, 1]} : vector<16x128xf32> to vector<16x1xf32>
    %45 = arith.truncf %39 : vector<1x128xf32> to vector<1x128xbf16>
    %cst_21 = arith.constant dense<0.000000e+00> : vector<1x16xf32>
    %46 = tpu.matmul %45, %43, %cst_21 {dimension_numbers = #tpu.dot_dimension_numbers<[1], [1], [0], [0], [0, 0, 1, 0], [], []>} : vector<1x128xbf16>, vector<16x128xbf16>, vector<1x16xf32> -> vector<1x16xf32>
    %47 = vector.broadcast %44 : vector<16x1xf32> to vector<16x16xf32>
    %48 = vector.broadcast %46 : vector<1x16xf32> to vector<16x16xf32>
    %49 = arith.addf %47, %48 : vector<16x16xf32>
    %cst_22 = arith.constant 2.000000e-01 : f32
    %50 = vector.broadcast %cst_22 : f32 to vector<16x16xf32>
    %51 = arith.mulf %50, %49 : vector<16x16xf32>
    %52 = arith.maximumf %49, %51 : vector<16x16xf32>
    %53 = arith.addf %52, %0 : vector<16x16xf32>
    %cst_23 = arith.constant dense<0xFF800000> : vector<16xf32>
    %54 = vector.multi_reduction <maximumf>, %53, %cst_23 [1] : vector<16x16xf32> to vector<16xf32>
    %55 = vector.shape_cast %54 : vector<16xf32> to vector<16x1xf32>
    %56 = vector.broadcast %55 : vector<16x1xf32> to vector<16x16xf32>
    %57 = arith.subf %53, %56 : vector<16x16xf32>
    %58 = math.exp %57 : vector<16x16xf32>
    %cst_24 = arith.constant dense<0.000000e+00> : vector<16xf32>
    %59 = vector.multi_reduction <add>, %58, %cst_24 [1] : vector<16x16xf32> to vector<16xf32>
    %60 = vector.shape_cast %59 : vector<16xf32> to vector<16x1xf32>
    %61 = tpu.reciprocal %60 {approx = true} : vector<16x1xf32> -> vector<16x1xf32>
    %62 = vector.broadcast %61 : vector<16x1xf32> to vector<16x16xf32>
    %63 = arith.mulf %58, %62 : vector<16x16xf32>
    %64 = arith.truncf %63 : vector<16x16xf32> to vector<16x16xbf16>
    %cst_25 = arith.constant dense<0.000000e+00> : vector<16x128xf32>
    %65 = tpu.matmul %64, %43, %cst_25 {dimension_numbers = #tpu.dot_dimension_numbers<[1], [0], [0], [1], [0, 0, 1, 1], [], []>} : vector<16x16xbf16>, vector<16x128xbf16>, vector<16x128xf32> -> vector<16x128xf32>
    %66 = vector.broadcast %38 : vector<1x128xf32> to vector<16x128xf32>
    %67 = arith.addf %65, %66 : vector<16x128xf32>
    %68 = vector.shape_cast %67 : vector<16x128xf32> to vector<2x8x128xf32>
    %cst_26 = arith.constant dense<0xFF800000> : vector<2x128xf32>
    %69 = vector.multi_reduction <maximumf>, %68, %cst_26 [1] : vector<2x8x128xf32> to vector<2x128xf32>
    %cst_27 = arith.constant dense<0.000000e+00> : vector<2x128xf32>
    %70 = vector.multi_reduction <add>, %68, %cst_27 [1] : vector<2x8x128xf32> to vector<2x128xf32>
    %cst_28 = arith.constant 1.250000e-01 : f32
    %71 = vector.broadcast %cst_28 : f32 to vector<2x128xf32>
    %72 = arith.mulf %70, %71 : vector<2x128xf32>
    %c0_29 = arith.constant 0 : index
    %c0_30 = arith.constant 0 : index
    %73 = vector.load %arg4[%c0_29, %c0_30] : memref<257x3xf32, #tpu.memory_space<vmem>>, vector<128x3xf32>
    %c128_31 = arith.constant 128 : index
    %c0_32 = arith.constant 0 : index
    %74 = vector.load %arg4[%c128_31, %c0_32] : memref<257x3xf32, #tpu.memory_space<vmem>>, vector<128x3xf32>
    %c256 = arith.constant 256 : index
    %c0_33 = arith.constant 0 : index
    %75 = vector.load %arg4[%c256, %c0_33] : memref<257x3xf32, #tpu.memory_space<vmem>>, vector<1x3xf32>
    %76 = arith.truncf %69 : vector<2x128xf32> to vector<2x128xbf16>
    %77 = arith.truncf %73 : vector<128x3xf32> to vector<128x3xbf16>
    %cst_34 = arith.constant dense<0.000000e+00> : vector<2x3xf32>
    %78 = tpu.matmul %76, %77, %cst_34 {dimension_numbers = #tpu.dot_dimension_numbers<[1], [0], [0], [1], [0, 0, 1, 1], [], []>} : vector<2x128xbf16>, vector<128x3xbf16>, vector<2x3xf32> -> vector<2x3xf32>
    %79 = arith.truncf %72 : vector<2x128xf32> to vector<2x128xbf16>
    %80 = arith.truncf %74 : vector<128x3xf32> to vector<128x3xbf16>
    %cst_35 = arith.constant dense<0.000000e+00> : vector<2x3xf32>
    %81 = tpu.matmul %79, %80, %cst_35 {dimension_numbers = #tpu.dot_dimension_numbers<[1], [0], [0], [1], [0, 0, 1, 1], [], []>} : vector<2x128xbf16>, vector<128x3xbf16>, vector<2x3xf32> -> vector<2x3xf32>
    %82 = arith.addf %78, %81 : vector<2x3xf32>
    %83 = vector.broadcast %75 : vector<1x3xf32> to vector<2x3xf32>
    %84 = arith.addf %82, %83 : vector<2x3xf32>
    %c0_36 = arith.constant 0 : index
    %c0_37 = arith.constant 0 : index
    %85 = vector.load %arg5[%c0_36, %c0_37] : memref<2x3xf32, #tpu.memory_space<vmem>>, vector<2x3xf32>
    tpu.vector_store %arg5[%c0_36, %c0_37], %84 {strides = array<i32>} : memref<2x3xf32, #tpu.memory_space<vmem>>, vector<2x3xf32>,
    return
  }
}

</mosaic_0001>

<bundles_post_ra>
// kernel: gat_regressor_forward.1
= control target key start
LH: loop header
LB: loop body
LE: loop exit
PB: predicated region body
PF: predicated region fallthrough
CT: control target
= control target key end

     0   :  { %v829_v3 = vmov 0.0   ;;  %vm830_vm0 = vmmov 0   ;;  %v831_v6 = vmov 32   ;;  %s1162_s0 = inlined_call_operand.vmem [shape: f32[16,128], index: 0, kind: input, shape index: {}]   ;;  %s1163_s1 = inlined_call_operand.vmem [shape: f32[16,16], index: 1, kind: input, shape index: {}]   ;;  %s1164_s2 = inlined_call_operand.vmem [shape: f32[130,128], index: 2, kind: input, shape index: {}]   ;;  %s1165_s3 = inlined_call_operand.vmem [shape: f32[130,128], index: 3, kind: input, shape index: {}]   ;;  %s1166_s4 = inlined_call_operand.vmem [shape: f32[257,3], index: 4, kind: input, shape index: {}]   ;;  %s1167_s5 = inlined_call_operand.hbm [shape: f32[2,3], index: 5, kind: output, shape index: {}]  }
   0x1   :  { %v42_v0 = vld [vmem:[%s1164_s2 + $0x70] sm:$0xff]  ;;  %v43_v1 = vld [vmem:[%s1164_s2 + $0x78] sm:$0xff]  ;;  %v40_v2 = vld [vmem:[%s1164_s2 + $0x60] sm:$0xff]  ;;  %681 = vmatprep.subr.bf16.mxu0 %v829_v3  ;;  %697 = vmatprep.mubr.msk.bf16.mxu0 %vm830_vm0, %v829_v3 }
   0x2   :  { %v54_v4 = vpack.c.bf16 %v43_v1, %v42_v0  ;;  %v41_v5 = vld [vmem:[%s1164_s2 + $0x68] sm:$0xff]  ;;  %789 = vset.pattern.permute.xlu0 %v831_v6  ;;  %701 = vmatprep.subr.bf16.mxu1 %v829_v3  ;;  %v38_v8 = vld [vmem:[%s1164_s2 + $0x50] sm:$0xff]  ;;  %v39_v9 = vld [vmem:[%s1164_s2 + $0x58] sm:$0xff] }
   0x3   :  { %v53_v7 = vpack.c.bf16 %v41_v5, %v40_v2  ;;  %703 = vmatprep.mubr.msk.bf16.mxu1 %vm830_vm0, %v829_v3  ;;  %790 = vset.pattern.permute.xlu1 %v831_v6 }
   0x4   :  { %682 = vmatpush3.bf16.msra.mxu0 %v54_v4 }
   0x5   :  { %683 = vmatprep.subr.bf16.mxu0 %v829_v3 }
   0x6   :  { %10 = vsyncpa [#allocation3], 0  ;;  %v52_v10 = vpack.c.bf16 %v39_v9, %v38_v8  ;;  %v36_v11 = vld [vmem:[%s1164_s2 + $0x40] sm:$0xff]  ;;  %v37_v12 = vld [vmem:[%s1164_s2 + $0x48] sm:$0xff]  ;;  %v148_v38 = vlaneseq  ;;  %vm160_vm1 = vcmask 130048   ;;  %vm520_vm2 = vcmask 1041409  }
   0x7   :  { %v51_v13 = vpack.c.bf16 %v37_v12, %v36_v11  ;;  %v34_v14 = vld [vmem:[%s1164_s2 + $0x30] sm:$0xff]  ;;  %v35_v15 = vld [vmem:[%s1164_s2 + $0x38] sm:$0xff]  ;;  %v32_v17 = vld [vmem:[%s1164_s2 + $0x20] sm:$0xff]  ;;  %s832_s27 = smov [#allocation2]   ;;  %vm616_vm3 = vcmask 17408  }
   0x8   :  { %684 = vmatpush3.bf16.msra.mxu0 %v53_v7  ;;  %v50_v16 = vpack.c.bf16 %v35_v15, %v34_v14  ;;  %v33_v18 = vld [vmem:[%s1164_s2 + $0x28] sm:$0xff]  ;;  %v30_v20 = vld [vmem:[%s1164_s2 + $0x10] sm:$0xff]  ;;  %v31_v21 = vld [vmem:[%s1164_s2 + $0x18] sm:$0xff]  ;;  %v940_v39 = vshrl.u32 %v148_v38, 7  ;;  %s624_s28 = sshll.u32 %s832_s27, 4  ;;  %s625_s28 = int_to_ptr.vmem [resolvable:$true] %s624_s28 }
   0x9   :  { %685 = vmatprep.subr.bf16.mxu0 %v829_v3  ;;  %v49_v19 = vpack.c.bf16 %v33_v18, %v32_v17  ;;  %v48_v22 = vpack.c.bf16 %v31_v21, %v30_v20  ;;  %v24_v23 = vld [vmem:[%s1162_s0] sm:$0xff]  ;;  %v25_v24 = vld [vmem:[%s1162_s0 + $0x8] sm:$0xff]  ;;  %v249_v11 = vld [vmem:[%s1165_s3 + $0x78] sm:$0xff]  ;;  %s807_s0 = scalar_lea.vmem %s625_s28, 32  ;;  %p812_p1 = scmp.lt.s32.totalorder %s625_s28, %s625_s28 }
   0xa   :  { %v28_v25 = vld [vmem:[%s1164_s2] sm:$0xff]  ;;  %v29_v26 = vld [vmem:[%s1164_s2 + $0x8] sm:$0xff]  ;;  %v26_v27 = vmax.f32 %v24_v23, 0.0  ;;  %v27_v28 = vmax.f32 %v25_v24, 0.0  ;;  %v150_v41 = vsub.s32 0, %v940_v39  ;;  %v244_v20 = vld [vmem:[%s1165_s3 + $0x50] sm:$0xff]  ;;  %p808_p0 = scmp.ne.s32.totalorder %s625_s28, %s807_s0  ;;  %p813_p2 = scmp.lt.s32.totalorder %s807_s0, %s807_s0 }
   0xb   :  { %v47_v29 = vpack.c.bf16 %v29_v26, %v28_v25  ;;  %v45_v36 = vld [vmem:[%s1164_s2 + $0x81] sm:$0x1]  ;;  %v953_v55 = vld [vmem:[%s1163_s1 + $0x8] sm:$0xff]  ;;  %v245_v21 = vld [vmem:[%s1165_s3 + $0x58] sm:$0xff] }
   0xc   :  { %686 = vmatpush3.bf16.msra.mxu0 %v52_v10  ;;  %v46_v30 = vpack.c.bf16 %v27_v28, %v26_v27  ;;  %v97_v37 = vpack.c.bf16 %v45_v36, %v45_v36  ;;  %v948_v52 = vld [vmem:[%s1163_s1] sm:$0xff]  ;;  %v248_v10 = vld [vmem:[%s1165_s3 + $0x70] sm:$0xff]  ;;  %v247_v18 = vld [vmem:[%s1165_s3 + $0x68] sm:$0xff]  ;;  %p814_p3 = por %p813_p2, %p812_p1 }
   0xd   :  { %687 = vmatprep.subr.bf16.mxu0 %v829_v3  ;;  %v260_v15 = vpack.c.bf16 %v249_v11, %v248_v10  ;;  %v246_v17 = vld [vmem:[%s1165_s3 + $0x60] sm:$0xff]  ;;  %v243_v24 = vld [vmem:[%s1165_s3 + $0x48] sm:$0xff]  ;;  %v240_v26 = vld [vmem:[%s1165_s3 + $0x30] sm:$0xff] }
   0xe   :  { %v242_v23 = vld [vmem:[%s1165_s3 + $0x40] sm:$0xff]  ;;  %v241_v27 = vld [vmem:[%s1165_s3 + $0x38] sm:$0xff]  ;;  %v235_v36 = vld [vmem:[%s1165_s3 + $0x8] sm:$0xff]  ;;  %p815_p4 = pnand %p814_p3, %p808_p0 }
   0xf   :  { %v257_v25 = vpack.c.bf16 %v243_v24, %v242_v23  ;;  %v256_v28 = vpack.c.bf16 %v241_v27, %v240_v26  ;;  %v632_v38 = vld [vmem:[%s1164_s2 + $0x80] ss:$0 sm:$0xff]  ;;  %v476_v23 = vld [vmem:[%s1166_s4 + $0x68] sm:$0xff] }
  0x10   :  { %688 = vmatpush3.bf16.msra.mxu0 %v51_v13 }
  0x11   :  { %689 = vmatprep.subr.bf16.mxu0 %v829_v3 }
  0x14   :  { %690 = vmatpush3.bf16.msra.mxu0 %v50_v16 }
  0x15   :  { %691 = vmatprep.subr.bf16.mxu0 %v829_v3 }
  0x18   :  { %692 = vmatpush3.bf16.msra.mxu0 %v49_v19  ;;  %v259_v19 = vpack.c.bf16 %v247_v18, %v246_v17 }
  0x19   :  { %693 = vmatprep.subr.bf16.mxu0 %v829_v3 }
  0x1c   :  { %694 = vmatpush3.bf16.msra.mxu0 %v48_v22  ;;  %v258_v22 = vpack.c.bf16 %v245_v21, %v244_v20  ;;  %v478_v20 = vld [vmem:[%s1166_s4 + $0x78] sm:$0xff] }
  0x1d   :  { %695 = vmatprep.subr.bf16.mxu0 %v829_v3 }
  0x20   :  { %696 = vmatpush3.bf16.msra.mxu0 %v47_v29  ;;  %v238_v29 = vld [vmem:[%s1165_s3 + $0x20] sm:$0xff] }
  0x21   :  { %733 = vmatprep.subr.bf16.mxu0 %v829_v3 }
  0x23   :  { %698 = vmatmul.mubr.bf16.vlgmr.msra.gmra.mxu0 %v46_v30  ;;  %v239_v30 = vld [vmem:[%s1165_s3 + $0x28] sm:$0xff] }
  0x24   :  { %735 = vmatprep.mubr.msk.bf16.mxu0 %vm830_vm0, %v829_v3 }
  0xe3   :  { %v89_v31 = vpop.f32.mrf.mxu0 }
  0xe4   :  { %140 = vperm.xlu0 %789, %v89_v31  }
  0xe5   :  { %v699_v32 = vpop.f32.mrf.mxu0 }
  0xe6   :  { %v236_v32 = vld [vmem:[%s1165_s3 + $0x10] sm:$0xff] }
  0xe7   :  { %v92_v33 = vpop.f32.mrf.mxu0 }
  0xe8   :  { %145 = vperm.xlu0 %789, %v92_v33   ;;  %v96_v34 = vpack.c.bf16 %v92_v33, %v89_v31  ;;  %v255_v31 = vpack.c.bf16 %v239_v30, %v238_v29  ;;  %v237_v33 = vld [vmem:[%s1165_s3 + $0x18] sm:$0xff] }
  0xe9   :  { %v700_v35 = vpop.f32.mrf.mxu0  ;;  %v494_v29 = vld [vmem:[%s1166_s4 + $0xf8] sm:$0xff] }
  0xea   :  { %702 = vmatpush3.bf16.xpose.msra.mxu1 %v96_v34  ;;  %v234_v35 = vld [vmem:[%s1165_s3] sm:$0xff] }
  0xeb   :  { %707 = vmatprep.subr.bf16.mxu1 %v829_v3 }
  0xf1   :  { %704 = vmatmul.mubr.bf16.vlgmr.msra.gmra.mxu1 %v97_v37  ;;  %v253_v37 = vpack.c.bf16 %v235_v36, %v234_v35  ;;  %v491_v35 = vld [vmem:[%s1166_s4 + $0xe0] sm:$0xff]  ;;  %v492_v36 = vld [vmem:[%s1166_s4 + $0xe8] sm:$0xff] }
  0xf2   :  { %708 = vmatpush3.bf16.msra.mxu1 %v96_v34  ;;  %709 = vmatprep.mubr.msk.bf16.mxu1 %vm830_vm0, %v829_v3  ;;  %v254_v34 = vpack.c.bf16 %v237_v33, %v236_v32 }
  0xf3   :  { %713 = vmatprep.subr.bf16.mxu1 %v829_v3 }
 0x15f   :  { %v141_v40 = vpop.permute.xlu0 %140 }
 0x163   :  { %v146_v44 = vpop.permute.xlu0 %145 }
 0x1b1   :  { %v132_v42 = vpop.f32.mrf.mxu1 }
 0x1b2   :  { %v151_v43 = vrot.slane %v132_v42, %v150_v41 }
 0x1b3   :  { %v705_v45 = vpop.f32.mrf.mxu1 }
 0x1b4   :  { %v152_v46 = vadd.f32 %v151_v43, %v141_v40  ;;  %v153_v47 = vadd.f32 %v151_v43, %v146_v44 }
 0x1b5   :  { %v135_v48 = vpop.f32.mrf.mxu1 }
 0x1b6   :  { %v154_v49 = vmul.f32 0.2, %v152_v46  ;;  %v155_v50 = vmul.f32 0.2, %v153_v47 }
 0x1b7   :  { %v706_v51 = vpop.f32.mrf.mxu1 }
 0x1b8   :  { %v156_v53 = vmax.f32 %v152_v46, %v154_v49  ;;  %v157_v54 = vmax.f32 %v153_v47, %v155_v50 }
 0x1ba   :  { %v158_v56 = vadd.f32 %v156_v53, %v948_v52  ;;  %v159_v58 = vadd.f32 %v157_v54, %v953_v55 }
 0x1bc   :  { %v161_v57 = vsel %vm160_vm1, %v158_v56, -inf  ;;  %v164_v59 = vsel %vm160_vm1, %v159_v58, -inf }
 0x1bd   :  { %162 = vmax.xlane.f32.xlu1 %v161_v57  ;;  %v251_v57 = vld [vmem:[%s1165_s3 + $0x81] sm:$0x1] }
 0x1c1   :  { %165 = vmax.xlane.f32.xlu1 %v164_v59 }
 0x246   :  { %v163_v60 = vpop.xlane.xlu1 %162 }
 0x247   :  { %v167_v61 = vsub.f32 %v158_v56, %v163_v60 }
 0x249   :  { %v169_v62 = vmul.f32 1.442695, %v167_v61 }
 0x24a   :  { %v166_v63 = vpop.xlane.xlu1 %165 }
 0x24b   :  { %791 = vpow2.f32 %v169_v62  ;;  %v168_v0 = vsub.f32 %v159_v58, %v166_v63  ;;  %v303_v58 = vpack.c.bf16 %v251_v57, %v251_v57  ;;  %v485_v57 = vld [vmem:[%s1166_s4 + $0xb0] sm:$0xff] }
 0x24d   :  { %v171_v1 = vmul.f32 1.442695, %v168_v0 }
 0x24f   :  { %793 = vpow2.f32 %v171_v1 }
 0x258   :  { %v792_v2 = vpop.eup %791 }
 0x259   :  { %v173_v4 = vsel %vm160_vm1, %v792_v2, 0.0 }
 0x25a   :  { %174 = vadd.xlane.f32.xlu0 %v173_v4 }
 0x25c   :  { %v794_v5 = vpop.eup %793 }
 0x25d   :  { %v176_v6 = vsel %vm160_vm1, %v794_v5, 0.0 }
 0x25e   :  { %177 = vadd.xlane.f32.xlu1 %v176_v6 }
 0x2e3   :  { %v175_v7 = vpop.xlane.xlu0 %174 }
 0x2e4   :  { %795 = vrcp.f32 %v175_v7 }
 0x2e7   :  { %v178_v8 = vpop.xlane.xlu1 %177 }
 0x2e8   :  { %797 = vrcp.f32 %v178_v8 }
 0x2f1   :  { %v796_v9 = vpop.eup %795 }
 0x2f2   :  { %v181_v13 = vmul.f32 %v796_v9, %v792_v2 }
 0x2f5   :  { %v798_v12 = vpop.eup %797 }
 0x2f6   :  { %v182_v14 = vmul.f32 %v798_v12, %v794_v5 }
 0x2f8   :  { %v183_v16 = vpack.c.bf16 %v182_v14, %v181_v13 }
 0x2fa   :  { %710 = vmatmul.mubr.msk.bf16.vlgmr.msra.gmra.mxu1 %vm160_vm1, %v183_v16 }
 0x2fb   :  { %714 = vmatpush3.bf16.msra.mxu1 %v260_v15  ;;  %729 = vmatprep.mubr.msk.bf16.mxu1 %vm830_vm0, %v829_v3 }
 0x2fc   :  { %715 = vmatprep.subr.bf16.mxu1 %v829_v3 }
 0x2ff   :  { %716 = vmatpush3.bf16.msra.mxu1 %v259_v19  ;;  %v477_v19 = vld [vmem:[%s1166_s4 + $0x70] sm:$0xff] }
 0x300   :  { %717 = vmatprep.subr.bf16.mxu1 %v829_v3  ;;  %v505_v21 = vpack.c.bf16 %v478_v20, %v477_v19 }
 0x303   :  { %718 = vmatpush3.bf16.msra.mxu1 %v258_v22  ;;  %v475_v22 = vld [vmem:[%s1166_s4 + $0x60] sm:$0xff] }
 0x304   :  { %719 = vmatprep.subr.bf16.mxu1 %v829_v3  ;;  %v504_v24 = vpack.c.bf16 %v476_v23, %v475_v22 }
 0x307   :  { %720 = vmatpush3.bf16.msra.mxu1 %v257_v25 }
 0x308   :  { %721 = vmatprep.subr.bf16.mxu1 %v829_v3 }
 0x30b   :  { %722 = vmatpush3.bf16.msra.mxu1 %v256_v28  ;;  %v493_v28 = vld [vmem:[%s1166_s4 + $0xf0] sm:$0xff] }
 0x30c   :  { %723 = vmatprep.subr.bf16.mxu1 %v829_v3  ;;  %v515_v33 = vpack.c.bf16 %v494_v29, %v493_v28 }
 0x30f   :  { %724 = vmatpush3.bf16.msra.mxu1 %v255_v31 }
 0x310   :  { %725 = vmatprep.subr.bf16.mxu1 %v829_v3 }
 0x313   :  { %726 = vmatpush3.bf16.msra.mxu1 %v254_v34 }
 0x314   :  { %727 = vmatprep.subr.bf16.mxu1 %v829_v3 }
 0x317   :  { %728 = vmatpush3.bf16.msra.mxu1 %v253_v37  ;;  %v514_v37 = vpack.c.bf16 %v492_v36, %v491_v35 }
 0x318   :  { %765 = vmatprep.subr.bf16.mxu1 %v829_v3 }
 0x3ba   :  { %v225_v40 = vpop.f32.mrf.mxu1 }
 0x3bb   :  { %v226_v43 = vadd.f32 %v632_v38, %v225_v40  ;;  %v474_v40 = vld [vmem:[%s1166_s4 + $0x58] sm:$0xff] }
 0x3bc   :  { %v711_v42 = vpop.f32.mrf.mxu1 }
 0x3bd   :  { %v232_v47 = vmax.f32 %v226_v43, 0.0  ;;  %v489_v43 = vld [vmem:[%s1166_s4 + $0xd0] sm:$0xff] }
 0x3be   :  { %v228_v44 = vpop.f32.mrf.mxu1 }
 0x3bf   :  { %v229_v45 = vadd.f32 %v632_v38, %v228_v44  ;;  %v473_v38 = vld [vmem:[%s1166_s4 + $0x50] sm:$0xff]  ;;  %v490_v44 = vld [vmem:[%s1166_s4 + $0xd8] sm:$0xff] }
 0x3c0   :  { %v712_v46 = vpop.f32.mrf.mxu1  ;;  %v503_v42 = vpack.c.bf16 %v474_v40, %v473_v38 }
 0x3c1   :  { %v233_v48 = vmax.f32 %v229_v45, 0.0  ;;  %v513_v45 = vpack.c.bf16 %v490_v44, %v489_v43  ;;  %v471_v46 = vld [vmem:[%s1166_s4 + $0x40] sm:$0xff] }
 0x3c3   :  { %v252_v49 = vpack.c.bf16 %v233_v48, %v232_v47  ;;  %v472_v47 = vld [vmem:[%s1166_s4 + $0x48] sm:$0xff] }
 0x3c4   :  { %v502_v48 = vpack.c.bf16 %v472_v47, %v471_v46 }
 0x3c5   :  { %730 = vmatmul.mubr.bf16.vlgmr.msra.gmra.mxu1 %v252_v49  ;;  %v487_v49 = vld [vmem:[%s1166_s4 + $0xc0] sm:$0xff] }
 0x3c6   :  { %781 = vmatprep.mubr.msk.bf16.mxu1 %vm830_vm0, %v829_v3  ;;  %766 = vmatpush3.bf16.msra.mxu1 %v505_v21 }
 0x3c7   :  { %767 = vmatprep.subr.bf16.mxu1 %v829_v3 }
 0x3ca   :  { %768 = vmatpush3.bf16.msra.mxu1 %v504_v24 }
 0x3cb   :  { %769 = vmatprep.subr.bf16.mxu1 %v829_v3 }
 0x3ce   :  { %770 = vmatpush3.bf16.msra.mxu1 %v503_v42 }
 0x3cf   :  { %771 = vmatprep.subr.bf16.mxu1 %v829_v3 }
 0x3d2   :  { %772 = vmatpush3.bf16.msra.mxu1 %v502_v48 }
 0x3d3   :  { %773 = vmatprep.subr.bf16.mxu1 %v829_v3 }
 0x485   :  { %v295_v50 = vpop.f32.mrf.mxu1 }
 0x486   :  { %346 = vperm.xlu1 %790, %v295_v50  }
 0x487   :  { %v731_v51 = vpop.f32.mrf.mxu1 }
 0x489   :  { %v298_v53 = vpop.f32.mrf.mxu1 }
 0x48a   :  { %v302_v54 = vpack.c.bf16 %v298_v53, %v295_v50  ;;  %351 = vperm.xlu1 %790, %v298_v53   ;;  %v488_v50 = vld [vmem:[%s1166_s4 + $0xc8] sm:$0xff]  ;;  %v469_v53 = vld [vmem:[%s1166_s4 + $0x30] sm:$0xff] }
 0x48b   :  { %v732_v56 = vpop.f32.mrf.mxu1  ;;  %v512_v51 = vpack.c.bf16 %v488_v50, %v487_v49 }
 0x48c   :  { %734 = vmatpush3.bf16.xpose.msra.mxu0 %v302_v54 }
 0x48d   :  { %739 = vmatprep.subr.bf16.mxu0 %v829_v3 }
 0x493   :  { %736 = vmatmul.mubr.bf16.vlgmr.msra.gmra.mxu0 %v303_v58  ;;  %v486_v58 = vld [vmem:[%s1166_s4 + $0xb8] sm:$0xff] }
 0x494   :  { %740 = vmatpush3.bf16.msra.mxu0 %v302_v54  ;;  %741 = vmatprep.mubr.msk.bf16.mxu0 %vm830_vm0, %v829_v3  ;;  %v470_v54 = vld [vmem:[%s1166_s4 + $0x38] sm:$0xff] }
 0x495   :  { %745 = vmatprep.subr.bf16.mxu0 %v829_v3  ;;  %v501_v56 = vpack.c.bf16 %v470_v54, %v469_v53 }
 0x497   :  { %774 = vmatpush3.bf16.msra.mxu1 %v501_v56 }
 0x498   :  { %775 = vmatprep.subr.bf16.mxu1 %v829_v3 }
 0x501   :  { %v347_v59 = vpop.permute.xlu1 %346 }
 0x505   :  { %v352_v62 = vpop.permute.xlu1 %351 }
 0x553   :  { %v338_v60 = vpop.f32.mrf.mxu0 }
 0x554   :  { %v357_v61 = vrot.slane %v338_v60, %v150_v41  ;;  %v467_v60 = vld [vmem:[%s1166_s4 + $0x20] sm:$0xff] }
 0x555   :  { %v737_v63 = vpop.f32.mrf.mxu0 }
 0x556   :  { %v358_v0 = vadd.f32 %v357_v61, %v347_v59  ;;  %v359_v1 = vadd.f32 %v357_v61, %v352_v62  ;;  %v511_v59 = vpack.c.bf16 %v486_v58, %v485_v57  ;;  %v468_v61 = vld [vmem:[%s1166_s4 + $0x28] sm:$0xff]  ;;  %v483_v63 = vld [vmem:[%s1166_s4 + $0xa0] sm:$0xff] }
 0x557   :  { %v341_v2 = vpop.f32.mrf.mxu0  ;;  %v500_v62 = vpack.c.bf16 %v468_v61, %v467_v60  ;;  %v636_v58 = vld [vmem:[%s1166_s4 + $0x100] ss:$0 sm:$0xff] }
 0x558   :  { %v360_v4 = vmul.f32 0.2, %v358_v0  ;;  %v361_v5 = vmul.f32 0.2, %v359_v1  ;;  %v465_v2 = vld [vmem:[%s1166_s4 + $0x10] sm:$0xff] }
 0x559   :  { %v738_v6 = vpop.f32.mrf.mxu0  ;;  %776 = vmatpush3.bf16.msra.mxu1 %v500_v62 }
 0x55a   :  { %v363_v7 = vmax.f32 %v359_v1, %v361_v5  ;;  %v362_v8 = vmax.f32 %v358_v0, %v360_v4  ;;  %v484_v0 = vld [vmem:[%s1166_s4 + $0xa8] sm:$0xff]  ;;  %777 = vmatprep.subr.bf16.mxu1 %v829_v3  ;;  %v466_v4 = vld [vmem:[%s1166_s4 + $0x18] sm:$0xff]  ;;  %v481_v6 = vld [vmem:[%s1166_s4 + $0x90] sm:$0xff] }
 0x55b   :  { %v510_v1 = vpack.c.bf16 %v484_v0, %v483_v63  ;;  %v499_v5 = vpack.c.bf16 %v466_v4, %v465_v2 }
 0x55c   :  { %v365_v9 = vadd.f32 %v363_v7, %v953_v55  ;;  %v364_v10 = vadd.f32 %v362_v8, %v948_v52  ;;  %v482_v7 = vld [vmem:[%s1166_s4 + $0x98] sm:$0xff] }
 0x55d   :  { %778 = vmatpush3.bf16.msra.mxu1 %v499_v5  ;;  %v509_v8 = vpack.c.bf16 %v482_v7, %v481_v6 }
 0x55e   :  { %v369_v11 = vsel %vm160_vm1, %v365_v9, -inf  ;;  %v366_v12 = vsel %vm160_vm1, %v364_v10, -inf  ;;  %779 = vmatprep.subr.bf16.mxu1 %v829_v3 }
 0x55f   :  { %370 = vmax.xlane.f32.xlu0 %v369_v11  ;;  %367 = vmax.xlane.f32.xlu1 %v366_v12  ;;  %v479_v12 = vld [vmem:[%s1166_s4 + $0x80] sm:$0xff] }
 0x5e8   :  { %v371_v39 = vpop.xlane.xlu0 %370  ;;  %v368_v41 = vpop.xlane.xlu1 %367 }
 0x5e9   :  { %v373_v13 = vsub.f32 %v365_v9, %v371_v39  ;;  %v372_v14 = vsub.f32 %v364_v10, %v368_v41  ;;  %v463_v9 = vld [vmem:[%s1166_s4] sm:$0xff]  ;;  %v464_v10 = vld [vmem:[%s1166_s4 + $0x8] sm:$0xff] }
 0x5ea   :  { %v498_v11 = vpack.c.bf16 %v464_v10, %v463_v9  ;;  %v480_v39 = vld [vmem:[%s1166_s4 + $0x88] sm:$0xff] }
 0x5eb   :  { %v374_v15 = vmul.f32 1.442695, %v372_v14  ;;  %v376_v16 = vmul.f32 1.442695, %v373_v13  ;;  %v508_v41 = vpack.c.bf16 %v480_v39, %v479_v12  ;;  %v634_v13 = vld [vmem:[%s1165_s3 + $0x80] ss:$0 sm:$0xff] }
 0x5ec   :  { %780 = vmatpush3.bf16.msra.mxu1 %v498_v11 }
 0x5ed   :  { %799 = vpow2.f32 %v374_v15 }
 0x5ee   :  { %801 = vpow2.f32 %v376_v16 }
 0x5fa   :  { %v800_v17 = vpop.eup %799 }
 0x5fb   :  { %v378_v18 = vsel %vm160_vm1, %v800_v17, 0.0  ;;  %v802_v55 = vpop.eup %801 }
 0x5fc   :  { %379 = vadd.xlane.f32.xlu0 %v378_v18  ;;  %v381_v52 = vsel %vm160_vm1, %v802_v55, 0.0 }
 0x600   :  { %382 = vadd.xlane.f32.xlu0 %v381_v52 }
 0x685   :  { %v380_v25 = vpop.xlane.xlu0 %379 }
 0x686   :  { %803 = vrcp.f32 %v380_v25 }
 0x689   :  { %v383_v26 = vpop.xlane.xlu0 %382 }
 0x68a   :  { %805 = vrcp.f32 %v383_v26 }
 0x693   :  { %v804_v27 = vpop.eup %803 }
 0x694   :  { %v386_v32 = vmul.f32 %v804_v27, %v800_v17 }
 0x697   :  { %v806_v30 = vpop.eup %805 }
 0x698   :  { %v387_v31 = vmul.f32 %v806_v30, %v802_v55 }
 0x69a   :  { %v388_v34 = vpack.c.bf16 %v387_v31, %v386_v32 }
 0x69c   :  { %742 = vmatmul.mubr.msk.bf16.vlgmr.msra.gmra.mxu0 %vm160_vm1, %v388_v34 }
 0x69d   :  { %746 = vmatpush3.bf16.msra.mxu0 %v515_v33  ;;  %761 = vmatprep.mubr.msk.bf16.mxu0 %vm830_vm0, %v829_v3 }
 0x69e   :  { %747 = vmatprep.subr.bf16.mxu0 %v829_v3 }
 0x6a1   :  { %748 = vmatpush3.bf16.msra.mxu0 %v514_v37 }
 0x6a2   :  { %749 = vmatprep.subr.bf16.mxu0 %v829_v3 }
 0x6a5   :  { %750 = vmatpush3.bf16.msra.mxu0 %v513_v45 }
 0x6a6   :  { %751 = vmatprep.subr.bf16.mxu0 %v829_v3 }
 0x6a9   :  { %752 = vmatpush3.bf16.msra.mxu0 %v512_v51 }
 0x6aa   :  { %753 = vmatprep.subr.bf16.mxu0 %v829_v3 }
 0x6ad   :  { %754 = vmatpush3.bf16.msra.mxu0 %v511_v59 }
 0x6ae   :  { %755 = vmatprep.subr.bf16.mxu0 %v829_v3 }
 0x6b1   :  { %756 = vmatpush3.bf16.msra.mxu0 %v510_v1 }
 0x6b2   :  { %757 = vmatprep.subr.bf16.mxu0 %v829_v3 }
 0x6b5   :  { %758 = vmatpush3.bf16.msra.mxu0 %v509_v8 }
 0x6b6   :  { %759 = vmatprep.subr.bf16.mxu0 %v829_v3 }
 0x6b9   :  { %760 = vmatpush3.bf16.msra.mxu0 %v508_v41 }
 0x75c   :  { %v430_v14 = vpop.f32.mrf.mxu0 }
 0x75d   :  { %v431_v15 = vadd.f32 %v634_v13, %v430_v14 }
 0x75e   :  { %v743_v16 = vpop.f32.mrf.mxu0 }
 0x75f   :  { %v437_v17 = vrot.slane %v431_v15, 4 }
 0x760   :  { %v433_v3 = vpop.f32.mrf.mxu0 }
 0x761   :  { %v438_v18 = vmax.f32 %v431_v15, %v437_v17  ;;  %v450_v55 = vadd.f32 %v437_v17, %v431_v15  ;;  %v434_v52 = vadd.f32 %v634_v13, %v433_v3 }
 0x762   :  { %v744_v19 = vpop.f32.mrf.mxu0 }
 0x763   :  { %v439_v20 = vrot.slane %v438_v18, 2  ;;  %v451_v21 = vrot.slane %v450_v55, 2  ;;  %v443_v22 = vrot.slane %v434_v52, 4 }
 0x765   :  { %v440_v23 = vmax.f32 %v438_v18, %v439_v20  ;;  %v452_v24 = vadd.f32 %v451_v21, %v450_v55  ;;  %v444_v25 = vmax.f32 %v434_v52, %v443_v22  ;;  %v456_v26 = vadd.f32 %v443_v22, %v434_v52 }
 0x767   :  { %v441_v27 = vrot.slane %v440_v23, 1  ;;  %v453_v28 = vrot.slane %v452_v24, 1  ;;  %v445_v29 = vrot.slane %v444_v25, 2  ;;  %v457_v30 = vrot.slane %v456_v26, 2 }
 0x769   :  { %v442_v31 = vmax.f32 %v440_v23, %v441_v27  ;;  %v454_v32 = vadd.f32 %v453_v28, %v452_v24  ;;  %v446_v33 = vmax.f32 %v444_v25, %v445_v29  ;;  %v458_v34 = vadd.f32 %v457_v30, %v456_v26 }
 0x76b   :  { %v461_v35 = vmul.f32 0.125, %v454_v32  ;;  %v447_v36 = vrot.slane %v446_v33, 1  ;;  %v459_v37 = vrot.slane %v458_v34, 1  ;;  %v496_v38 = vpack.c.bf16 %v442_v31, %v442_v31 }
 0x76d   :  { %v448_v40 = vmax.f32 %v446_v33, %v447_v36  ;;  %v460_v42 = vadd.f32 %v459_v37, %v458_v34  ;;  %v506_v43 = vpack.c.bf16 %v461_v35, %v461_v35  ;;  %v566_v46 = vunpack.c.l.b16 %v496_v38 }
 0x76f   :  { %v462_v44 = vmul.f32 0.125, %v460_v42  ;;  %v497_v45 = vpack.c.bf16 %v448_v40, %v448_v40  ;;  %v518_v49 = vunpack.c.l.b16 %v506_v43 }
 0x771   :  { %v507_v47 = vpack.c.bf16 %v462_v44, %v462_v44  ;;  %v567_v48 = vunpack.c.l.b16 %v497_v45 }
 0x773   :  { %v519_v50 = vunpack.c.l.b16 %v507_v47  ;;  %v568_v51 = vsel %vm520_vm2, %v567_v48, %v566_v46 }
 0x774   :  { %v569_v53 = vpack.c.b16 %v568_v51, %v568_v51 }
 0x775   :  { %v521_v54 = vsel %vm520_vm2, %v519_v50, %v518_v49 }
 0x776   :  { %782 = vmatmul.mubr.bf16.vlgmr.msra.gmra.mxu1 %v569_v53  ;;  %v522_v56 = vpack.c.b16 %v521_v54, %v521_v54 }
 0x778   :  { %762 = vmatmul.mubr.bf16.vlgmr.msra.gmra.mxu0 %v522_v56 }
 0x836   :  { %v605_v57 = vpop.f32.mrf.mxu1 }
 0x838   :  { %v558_v59 = vpop.f32.mrf.mxu0  ;;  %v783_v60 = vpop.f32.mrf.mxu1 }
 0x839   :  { %v606_v61 = vadd.f32 %v605_v57, %v558_v59 }
 0x83a   :  { %v763_v62 = vpop.f32.mrf.mxu0  ;;  %v608_v63 = vpop.f32.mrf.mxu1 }
 0x83b   :  { %v615_v0 = vadd.f32 %v636_v58, %v606_v61 }
 0x83c   :  { %v561_v1 = vpop.f32.mrf.mxu0  ;;  %v784_v2 = vpop.f32.mrf.mxu1 }
 0x83d   :  { %617 = vst.msk [vmem:[#allocation2] sm:$0x3] %vm616_vm3, %v615_v0 }
 0x83e   :  { %v764_v4 = vpop.f32.mrf.mxu0 }
 0x83f   :  { %818 = shalt.err (!%p815_p4)
}
 0x840   :  { %627 = dma.vmem_to_hbm [thread:$0]  %s625_s28, 32, %s1167_s5, [#allocation3]  }
 0x841   :  { %827 = dma.done.wait [#allocation3], 32  }
 0x842   :  { %828 = vsyncadd [#allocation3], 4294967264 }
 0x843   :  { %631 = vsyncpa [#allocation3], 1 }

</bundles_post_ra>
